<compile_context>
chip_gen: v7x
topology: tpu7x:2x2x1
jax: 0.10.0
libtpu: 0.0.40
codegen_flags: <defaults>
</compile_context>

<pallas_src>
import jax
import jax.numpy as jnp
from jax.experimental import pallas as pl
from jax.experimental.pallas import tpu as pltpu

DIM = 64          # matches `dim = 64` in the reference file
LN_EPS = 1e-5     # nn.LayerNorm default eps
_HIGHEST = jax.lax.Precision.HIGHEST


def _round_up(x, m):
    return (x + m - 1) // m * m


def _pick_tile(packed_rows, row_tile):
    # Multiple of 8 (sublane), <= row_tile, and small enough that the row grid
    # keeps >= 4 steps for large inputs (v7x has 2 TensorCores on the parallel
    # row axis, plus the pipeline needs something to overlap).
    return min(row_tile, max(8, _round_up(pl.cdiv(packed_rows, 4), 8)))


# ---------------------- fused PreNorm(LayerNorm)+Linear ----------------------
def _prenorm_linear_kernel(x_ref, a_ref, w_ref, b_ref, o_ref):
    # x_ref: (tile, pack*D)           packed rows, pack segments of D lanes each
    # a_ref: (pack*D, pack*D)         block-diagonal segment-averaging matrix (1/D)
    # w_ref: (pack*D, pack*D_out)     blockdiag(gamma-folded W', ...)
    # b_ref: (1, pack*D_out)          beta-folded bias, tiled per segment
    x = x_ref[...].astype(jnp.float32)
    a = a_ref[...]
    mean = jnp.dot(x, a, preferred_element_type=jnp.float32, precision=_HIGHEST)
    xc = x - mean
    var = jnp.dot(xc * xc, a, preferred_element_type=jnp.float32, precision=_HIGHEST)
    xn = xc * jax.lax.rsqrt(var + LN_EPS)          # gamma/beta folded into W'/b'
    acc = jnp.dot(xn, w_ref[...], preferred_element_type=jnp.float32,
                  precision=_HIGHEST)
    o_ref[...] = (acc + b_ref[...]).astype(o_ref.dtype)


def prenorm_linear(x2d, a_mat, w_bd, b_tiled, d_out, pack, *, row_tile=4096):
    rows, d = x2d.shape
    assert rows % pack == 0
    pr = rows // pack
    dp_in = d * pack
    dp_out = d_out * pack
    xp = x2d.reshape(pr, dp_in)                    # lane-dense view, free (row-major)
    tile = _pick_tile(pr, row_tile)
    out = pl.pallas_call(
        _prenorm_linear_kernel,
        out_shape=jax.ShapeDtypeStruct((pr, dp_out), x2d.dtype),
        grid_spec=pl.GridSpec(
            grid=(pl.cdiv(pr, tile),),             # ragged last block: stores masked
            in_specs=[
                pl.BlockSpec((tile, dp_in), lambda i: (i, 0)),
                pl.BlockSpec((dp_in, dp_in), lambda i: (0, 0)),    # resident avg matrix
                pl.BlockSpec((dp_in, dp_out), lambda i: (0, 0)),   # resident weight
                pl.BlockSpec((1, dp_out), lambda i: (0, 0)),       # resident bias
            ],
            out_specs=pl.BlockSpec((tile, dp_out), lambda i: (i, 0)),
        ),
        compiler_params=pltpu.CompilerParams(
            dimension_semantics=("parallel",),
        ),
    )(xp, a_mat, w_bd, b_tiled.reshape(1, dp_out))
    return out.reshape(rows, d_out)


# --------------------- standalone LayerNorm (generic fn path) ----------------
def _layernorm_kernel(x_ref, a_ref, g_ref, b_ref, o_ref):
    x = x_ref[...].astype(jnp.float32)
    a = a_ref[...]
    mean = jnp.dot(x, a, preferred_element_type=jnp.float32, precision=_HIGHEST)
    xc = x - mean
    var = jnp.dot(xc * xc, a, preferred_element_type=jnp.float32, precision=_HIGHEST)
    y = xc * jax.lax.rsqrt(var + LN_EPS) * g_ref[...] + b_ref[...]
    o_ref[...] = y.astype(o_ref.dtype)


def layernorm(x2d, a_mat, gamma_t, beta_t, pack, *, row_tile=4096):
    rows, d = x2d.shape
    assert rows % pack == 0
    pr = rows // pack
    dp = d * pack
    xp = x2d.reshape(pr, dp)
    tile = _pick_tile(pr, row_tile)
    out = pl.pallas_call(
        _layernorm_kernel,
        out_shape=jax.ShapeDtypeStruct((pr, dp), x2d.dtype),
        grid_spec=pl.GridSpec(
            grid=(pl.cdiv(pr, tile),),
            in_specs=[
                pl.BlockSpec((tile, dp), lambda i: (i, 0)),
                pl.BlockSpec((dp, dp), lambda i: (0, 0)),
                pl.BlockSpec((1, dp), lambda i: (0, 0)),
                pl.BlockSpec((1, dp), lambda i: (0, 0)),
            ],
            out_specs=pl.BlockSpec((tile, dp), lambda i: (i, 0)),
        ),
        compiler_params=pltpu.CompilerParams(
            dimension_semantics=("parallel",),
        ),
    )(xp, a_mat, gamma_t.reshape(1, dp), beta_t.reshape(1, dp))
    return out.reshape(rows, d)


# --------------------------------- modules -----------------------------------
class Linear:
    """Simple Linear(d_in, d_out) parameter holder (used for the fused path)."""

    def __init__(self, w, b):
        self.w = w          # (d_in, d_out)
        self.b = b          # (d_out,)

    def __call__(self, y):  # generic (unfused) application, kept for completeness
        b_, n_, d_ = y.shape
        out = jnp.einsum("rd,de->re", y.reshape(b_ * n_, d_), self.w) + self.b
        return out.reshape(b_, n_, -1)


class PreNorm:
    """JAX/Pallas port of the PyTorch PreNorm module: fn(LayerNorm(x)).

    Note: LN statistics / matmul accumulation are always f32; if x is stored in
    bf16 the only precision loss vs. a f32 PyTorch pipeline is the final downcast.
    """

    def __init__(self, dim, fn):
        self.dim = dim
        self.fn = fn
        # nn.LayerNorm default init: weight = ones, bias = zeros
        self.gamma = jnp.ones((dim,), jnp.float32)
        self.beta = jnp.zeros((dim,), jnp.float32)
        # How many logical rows pack into the 128-lane axis.
        self._pack = 128 // dim if (dim <= 128 and 128 % dim == 0) else 1
        # One-time parameter prep (hoisted out of __call__), cached per pack.
        self._fused_cache = {}
        self._ln_cache = {}

    def _avg_matrix(self, pack):
        seg = jnp.full((self.dim, self.dim), 1.0 / self.dim, jnp.float32)
        return jnp.kron(jnp.eye(pack, dtype=jnp.float32), seg)

    def _fused_params(self, pack):
        if pack not in self._fused_cache:
            w = self.fn.w.astype(jnp.float32)
            b = self.fn.b.astype(jnp.float32)
            w_f = self.gamma[:, None] * w                     # fold gamma into W
            b_f = self.beta @ w + b                           # fold beta into bias
            w_bd = jnp.kron(jnp.eye(pack, dtype=jnp.float32), w_f)
            self._fused_cache[pack] = (self._avg_matrix(pack), w_bd, jnp.tile(b_f, pack))
        return self._fused_cache[pack]

    def _ln_params(self, pack):
        if pack not in self._ln_cache:
            self._ln_cache[pack] = (self._avg_matrix(pack),
                                    jnp.tile(self.gamma, pack),
                                    jnp.tile(self.beta, pack))
        return self._ln_cache[pack]

    def __call__(self, x, **kwargs):
        b, n, d = x.shape
        assert d == self.dim
        rows = b * n
        pack = self._pack if rows % self._pack == 0 else 1   # odd rows: unpacked path
        x2d = x.reshape(rows, d)
        if isinstance(self.fn, Linear) and not kwargs:
            # Fused path: single kernel does LN-normalize + matmul + bias,
            # lane-dense packed (pack rows per 128-lane vreg row).
            a_mat, w_bd, b_t = self._fused_params(pack)
            d_out = self.fn.w.shape[1]
            y2d = prenorm_linear(x2d, a_mat, w_bd, b_t, d_out, pack)
            return y2d.reshape(b, n, d_out)
        # Generic path: LayerNorm kernel, then arbitrary fn.
        a_mat, g_t, bt_t = self._ln_params(pack)
        y2d = layernorm(x2d, a_mat, g_t, bt_t, pack)
        return self.fn(y2d.reshape(b, n, d), **kwargs)


if __name__ == "__main__":
    key = jax.random.PRNGKey(0)
    kx, kw, kb, kx2 = jax.random.split(key, 4)

    B, N, D = 2, 8, DIM
    x = jax.random.normal(kx, (B, N, D), jnp.float32)
    w = jax.random.normal(kw, (D, D), jnp.float32) * 0.02
    bias = jax.random.normal(kb, (D,), jnp.float32) * 0.02

    def ln_ref(xx, gamma, beta):
        mean = jnp.mean(xx, axis=-1, keepdims=True)
        var = jnp.mean((xx - mean) ** 2, axis=-1, keepdims=True)
        return (xx - mean) / jnp.sqrt(var + LN_EPS) * gamma + beta

    # ---- fused PreNorm(LayerNorm) + Linear, lane-dense packed (pack=2) ----
    module = PreNorm(D, Linear(w, bias))
    out = jax.block_until_ready(module(x))
    ref = jnp.einsum("bnd,de->bne", ln_ref(x, module.gamma, module.beta), w) + bias
    assert out.shape == ref.shape
    assert jnp.allclose(out, ref, atol=2e-4, rtol=2e-4)

    # ---- odd row count: pack=1 fallback + ragged last block (masked stores) ----
    x_r = jax.random.normal(kx2, (3, 5, D), jnp.float32)
    out_r = jax.block_until_ready(module(x_r))
    ref_r = jnp.einsum("bnd,de->bne", ln_ref(x_r, module.gamma, module.beta), w) + bias
    assert jnp.allclose(out_r, ref_r, atol=2e-4, rtol=2e-4)

    # ---- generic path (standalone LayerNorm kernel + arbitrary fn) ----
    module_generic = PreNorm(D, lambda y: y * 2.0)
    out2 = jax.block_until_ready(module_generic(x))
    ref2 = ln_ref(x, module_generic.gamma, module_generic.beta) * 2.0
    assert jnp.allclose(out2, ref2, atol=2e-4, rtol=2e-4)

    print("KERNEL_OK")
</pallas_src>

<mosaic_0001>
module attributes {stable_mosaic.version = 11 : i64} {
  func.func @_prenorm_linear_kernel(%arg0: i32, %arg1: memref<8x128xf32, #tpu.memory_space<vmem>>, %arg2: memref<128x128xf32, #tpu.memory_space<vmem>>, %arg3: memref<128x128xf32, #tpu.memory_space<vmem>>, %arg4: memref<1x128xf32, #tpu.memory_space<vmem>>, %arg5: memref<8x128xf32, #tpu.memory_space<vmem>>) attributes {dimension_semantics = [#tpu.dimension_semantics<parallel>], iteration_bounds = array<i64: 1>, scalar_prefetch = 0 : i64, scratch_operands = 0 : i64, tpu.core_type = #tpu.core_type<tc>, window_params = [{transform_indices = @transform_0, window_bounds = array<i64: 8, 128>}, {pipeline_mode = #tpu.pipeline_mode<synchronous>, transform_indices = @transform_1, window_bounds = array<i64: 128, 128>}, {pipeline_mode = #tpu.pipeline_mode<synchronous>, transform_indices = @transform_2, window_bounds = array<i64: 128, 128>}, {pipeline_mode = #tpu.pipeline_mode<synchronous>, transform_indices = @transform_3, window_bounds = array<i64: 1, 128>}, {transform_indices = @transform_4, window_bounds = array<i64: 8, 128>}]} {
    %c0 = arith.constant 0 : index
    %c0_0 = arith.constant 0 : index
    %0 = vector.load %arg1[%c0, %c0_0] : memref<8x128xf32, #tpu.memory_space<vmem>>, vector<8x128xf32>
    %c0_1 = arith.constant 0 : index
    %c0_2 = arith.constant 0 : index
    %1 = vector.load %arg2[%c0_1, %c0_2] : memref<128x128xf32, #tpu.memory_space<vmem>>, vector<128x128xf32>
    %cst = arith.constant dense<0.000000e+00> : vector<8x128xf32>
    %2 = tpu.matmul %0, %1, %cst {dimension_numbers = #tpu.dot_dimension_numbers<[1], [0], [0], [1], [0, 0, 1, 1], [], []>, precision = #tpu.contract_precision<fp32>} : vector<8x128xf32>, vector<128x128xf32>, vector<8x128xf32> -> vector<8x128xf32>
    %3 = arith.subf %0, %2 : vector<8x128xf32>
    %4 = arith.mulf %3, %3 : vector<8x128xf32>
    %cst_3 = arith.constant dense<0.000000e+00> : vector<8x128xf32>
    %5 = tpu.matmul %4, %1, %cst_3 {dimension_numbers = #tpu.dot_dimension_numbers<[1], [0], [0], [1], [0, 0, 1, 1], [], []>, precision = #tpu.contract_precision<fp32>} : vector<8x128xf32>, vector<128x128xf32>, vector<8x128xf32> -> vector<8x128xf32>
    %cst_4 = arith.constant 9.99999974E-6 : f32
    %6 = vector.broadcast %cst_4 : f32 to vector<8x128xf32>
    %7 = arith.addf %5, %6 : vector<8x128xf32>
    %8 = math.rsqrt %7 : vector<8x128xf32>
    %9 = arith.mulf %3, %8 : vector<8x128xf32>
    %c0_5 = arith.constant 0 : index
    %c0_6 = arith.constant 0 : index
    %10 = vector.load %arg3[%c0_5, %c0_6] : memref<128x128xf32, #tpu.memory_space<vmem>>, vector<128x128xf32>
    %cst_7 = arith.constant dense<0.000000e+00> : vector<8x128xf32>
    %11 = tpu.matmul %9, %10, %cst_7 {dimension_numbers = #tpu.dot_dimension_numbers<[1], [0], [0], [1], [0, 0, 1, 1], [], []>, precision = #tpu.contract_precision<fp32>} : vector<8x128xf32>, vector<128x128xf32>, vector<8x128xf32> -> vector<8x128xf32>
    %c0_8 = arith.constant 0 : index
    %c0_9 = arith.constant 0 : index
    %12 = vector.load %arg4[%c0_8, %c0_9] : memref<1x128xf32, #tpu.memory_space<vmem>>, vector<1x128xf32>
    %13 = vector.broadcast %12 : vector<1x128xf32> to vector<8x128xf32>
    %14 = arith.addf %11, %13 : vector<8x128xf32>
    %c0_10 = arith.constant 0 : index
    %c0_11 = arith.constant 0 : index
    %15 = vector.load %arg5[%c0_10, %c0_11] : memref<8x128xf32, #tpu.memory_space<vmem>>, vector<8x128xf32>
    tpu.vector_store %arg5[%c0_10, %c0_11], %14 {strides = array<i32>} : memref<8x128xf32, #tpu.memory_space<vmem>>, vector<8x128xf32>,
    return
  }
  func.func @transform_0(%arg0: i32) -> (i32, i32) {
    %c0_i32 = arith.constant 0 : i32
    %c0_i32_0 = arith.constant 0 : i32
    return %arg0, %c0_i32 : i32, i32
  }
  func.func @transform_1(%arg0: i32) -> (i32, i32) {
    %c0_i32 = arith.constant 0 : i32
    %c0_i32_0 = arith.constant 0 : i32
    %c0_i32_1 = arith.constant 0 : i32
    return %c0_i32, %c0_i32_0 : i32, i32
  }
  func.func @transform_2(%arg0: i32) -> (i32, i32) {
    %c0_i32 = arith.constant 0 : i32
    %c0_i32_0 = arith.constant 0 : i32
    %c0_i32_1 = arith.constant 0 : i32
    return %c0_i32, %c0_i32_0 : i32, i32
  }
  func.func @transform_3(%arg0: i32) -> (i32, i32) {
    %c0_i32 = arith.constant 0 : i32
    %c0_i32_0 = arith.constant 0 : i32
    %c0_i32_1 = arith.constant 0 : i32
    return %c0_i32, %c0_i32_0 : i32, i32
  }
  func.func @transform_4(%arg0: i32) -> (i32, i32) {
    %c0_i32 = arith.constant 0 : i32
    %c0_i32_0 = arith.constant 0 : i32
    return %arg0, %c0_i32 : i32, i32
  }
}

</mosaic_0001>

<bundles_post_ra>
// kernel: tpu_custom_call.1
= control target key start
LH: loop header
LB: loop body
LE: loop exit
PB: predicated region body
PF: predicated region fallthrough
CT: control target
= control target key end

     0   :  { %9 = vsyncpa [#allocation3], 0  ;;  %s4369_s0 = inlined_call_operand.hbm [shape: f32[8,128], index: 0, kind: input, shape index: {}]   ;;  %s4370_s1 = inlined_call_operand.hbm [shape: f32[128,128], index: 1, kind: input, shape index: {}]   ;;  %s4371_s2 = inlined_call_operand.hbm [shape: f32[128,128], index: 2, kind: input, shape index: {}]   ;;  %s4372_s3 = inlined_call_operand.vmem [shape: f32[1,128], index: 3, kind: input, shape index: {}]   ;;  %s4373_s4 = inlined_call_operand.hbm [shape: f32[8,128], index: 4, kind: output, shape index: {}]  }
   0x1   :  { %10 = vsyncpa [#allocation6], 0 }
   0x2   :  { %11 = vsyncpa [#allocation4], 0  ;;  %s3546_s15 = smov [#allocation5]   ;;  %s3452_s19 = scalar_lea.hbm %s4370_s1, 2048 }
   0x3   :  { %s27_s16 = sshll.u32 %s3546_s15, 4  ;;  %p3453_p0 = scmp.ne.s32.totalorder %s4370_s1, %s3452_s19  ;;  %s28_s16 = int_to_ptr.vmem [resolvable:$true] %s27_s16 }
   0x4   :  { %p3456_p1 = scmp.lt.u32.totalorder %s3452_s19, %s4370_s1 }
   0x6   :  { %p3458_p2 = pnand %p3456_p1, %p3453_p0 }
   0x8   :  { %3461 = shalt.err (!%p3458_p2)
}
   0x9   :  { %s3462_s24 = scalar_lea.vmem %s28_s16, 2048  ;;  %p3467_p4 = scmp.lt.s32.totalorder %s28_s16, %s28_s16 }
   0xa   :  { %p3463_p3 = scmp.ne.s32.totalorder %s28_s16, %s3462_s24  ;;  %p3468_p5 = scmp.lt.s32.totalorder %s3462_s24, %s3462_s24 }
   0xc   :  { %p3469_p6 = por %p3468_p5, %p3467_p4 }
   0xe   :  { %p3470_p7 = pnand %p3469_p6, %p3463_p3 }
  0x10   :  { %3473 = shalt.err (!%p3470_p7)
}
  0x11   :  { %s3547_s25 = smov 128   ;;  %s3548_s26 = smov 8  }
  0x12   :  { %33 = dma.hbm_to_vmem [thread:$0]  %s4370_s1, 2048, %s28_s16, [#allocation6], %s3547_s25, %s3547_s25, %s3548_s26  }
  0x13   :  { %s3549_s29 = smov [#allocation2]   ;;  %s3550_s5 = smov [#allocation7]  }
  0x14   :  { %s18_s30 = sshll.u32 %s3549_s29, 4  ;;  %s39_s6 = sshll.u32 %s3550_s5, 4  ;;  %s19_s30 = int_to_ptr.vmem [resolvable:$true] %s18_s30  ;;  %s40_s6 = int_to_ptr.vmem [resolvable:$true] %s39_s6 }
  0x15   :  { %s3474_s9 = scalar_lea.hbm %s4369_s0, 128 }
  0x16   :  { %p3475_p8 = scmp.ne.s32.totalorder %s4369_s0, %s3474_s9  ;;  %p3478_p9 = scmp.lt.u32.totalorder %s3474_s9, %s4369_s0 }
  0x18   :  { %p3480_p10 = pnand %p3478_p9, %p3475_p8 }
  0x1a   :  { %3483 = shalt.err (!%p3480_p10)
}
  0x1b   :  { %s3484_s1 = scalar_lea.vmem %s19_s30, 128  ;;  %p3489_p12 = scmp.lt.s32.totalorder %s19_s30, %s19_s30 }
  0x1c   :  { %p3485_p11 = scmp.ne.s32.totalorder %s19_s30, %s3484_s1  ;;  %p3490_p13 = scmp.lt.s32.totalorder %s3484_s1, %s3484_s1 }
  0x1e   :  { %p3491_p0 = por %p3490_p13, %p3489_p12 }
  0x20   :  { %p3492_p1 = pnand %p3491_p0, %p3485_p11 }
  0x22   :  { %3495 = shalt.err (!%p3492_p1)
}
  0x23   :  { %21 = dma.hbm_to_vmem [thread:$0]  %s4369_s0, 128, %s19_s30, [#allocation3]  }
  0x24   :  { %s3496_s18 = scalar_lea.hbm %s4371_s2, 2048 }
  0x25   :  { %p3497_p2 = scmp.ne.s32.totalorder %s4371_s2, %s3496_s18  ;;  %p3500_p3 = scmp.lt.u32.totalorder %s3496_s18, %s4371_s2 }
  0x27   :  { %p3502_p4 = pnand %p3500_p3, %p3497_p2 }
  0x29   :  { %3505 = shalt.err (!%p3502_p4)
}
  0x2a   :  { %s3506_s23 = scalar_lea.vmem %s40_s6, 2048  ;;  %p3511_p6 = scmp.lt.s32.totalorder %s40_s6, %s40_s6 }
  0x2b   :  { %p3507_p5 = scmp.ne.s32.totalorder %s40_s6, %s3506_s23  ;;  %p3512_p7 = scmp.lt.s32.totalorder %s3506_s23, %s3506_s23 }
  0x2d   :  { %p3513_p8 = por %p3512_p7, %p3511_p6 }
  0x2f   :  { %p3514_p9 = pnand %p3513_p8, %p3507_p5 }
  0x31   :  { %3517 = shalt.err (!%p3514_p9)
}
  0x32   :  { %45 = dma.hbm_to_vmem [thread:$0]  %s4371_s2, 2048, %s40_s6, [#allocation6], %s3547_s25, %s3547_s25, %s3548_s26  }
  0x33   :  { %3540 = dma.done.wait [#allocation3], 128  }
  0x34   :  { %3541 = vsyncadd [#allocation3], 4294967168 }
  0x35   :  { %3542 = dma.done.wait [#allocation6], 4096  }
  0x36   :  { %3543 = vsyncadd [#allocation6], 4294963200  ;;  %v3551_v0 = vmov 0.0|0.0   ;;  %vm3552_vm0 = vmmov 0   ;;  %v3553_v1 = vmov 0.0   ;;  %v58_v2 = vld [vmem:[#allocation5] sm:$0xff] }
  0x37   :  { %2978 = vmatprep.subr.bf16.mxu1 %v3551_v0  ;;  %3050 = vmatprep.subr.bf16.mxu0 %v3551_v0  ;;  %v59_v3 = vld [vmem:[#allocation5 + $0x8] sm:$0xff]  ;;  %v60_v4 = vld [vmem:[#allocation5 + $0x10] sm:$0xff]  ;;  %v75_v5 = vand.u32 4294901760, %v58_v2  ;;  %v61_v7 = vld [vmem:[#allocation5 + $0x18] sm:$0xff]  ;;  %s3554_s26 = smov [#allocation8]  }
  0x38   :  { %2380 = vmatprep.mubr.msk.f32.mxu1 %vm3552_vm0, %v3553_v1  ;;  %2485 = vmatprep.mubr.msk.f32.mxu0 %vm3552_vm0, %v3553_v1  ;;  %v78_v6 = vand.u32 4294901760, %v59_v3  ;;  %v81_v8 = vand.u32 4294901760, %v60_v4  ;;  %v84_v9 = vand.u32 4294901760, %v61_v7  ;;  %v62_v10 = vld [vmem:[#allocation5 + $0x20] sm:$0xff]  ;;  %v3628_v11 = vld [vmem:[#allocation5 + $0x28] sm:$0xff]  ;;  %v3639_v16 = vld [vmem:[#allocation5 + $0x30] sm:$0xff] }
  0x39   :  { %v87_v14 = vand.u32 4294901760, %v62_v10  ;;  %v90_v15 = vand.u32 4294901760, %v3628_v11  ;;  %v3641_v17 = vld [vmem:[#allocation5 + $0x38] sm:$0xff]  ;;  %v93_v19 = vand.u32 4294901760, %v3639_v16  ;;  %v3651_v21 = vld [vmem:[#allocation5 + $0x40] sm:$0xff]  ;;  %v3653_v22 = vld [vmem:[#allocation5 + $0x48] sm:$0xff]  ;;  %v3688_v35 = vsub.f32 %v58_v2, %v75_v5 }
  0x3a   :  { %v3630_v12 = vpack.c.bf16 %v78_v6, %v75_v5  ;;  %v3634_v13 = vpack.c.bf16 %v84_v9, %v81_v8  ;;  %v96_v20 = vand.u32 4294901760, %v3641_v17  ;;  %v3655_v23 = vld [vmem:[#allocation2] sm:$0xff]  ;;  %v99_v25 = vand.u32 4294901760, %v3651_v21  ;;  %v3665_v27 = vld [vmem:[#allocation5 + $0x50] sm:$0xff]  ;;  %v3684_v33 = vld [vmem:[#allocation5 + $0x60] sm:$0xff]  ;;  %s2031_s27 = sshll.u32 %s3554_s26, 4  ;;  %s2032_s27 = int_to_ptr.vmem [resolvable:$true] %s2031_s27 }
  0x3b   :  { %v3645_v18 = vpack.c.bf16 %v90_v15, %v87_v14  ;;  %v102_v26 = vand.u32 4294901760, %v3653_v22  ;;  %v3669_v28 = vld [vmem:[#allocation5 + $0x58] sm:$0xff]  ;;  %v3672_v29 = vand.u32 4294901760, %v3655_v23  ;;  %v105_v30 = vand.u32 4294901760, %v3665_v27  ;;  %v3686_v34 = vld [vmem:[#allocation5 + $0x68] sm:$0xff]  ;;  %v3700_v40 = vld [vmem:[#allocation5 + $0x70] sm:$0xff]  ;;  %p3523_p11 = scmp.lt.s32.totalorder %s2032_s27, %s2032_s27 }
  0x3c   :  { %2980 = vmatpush3.bf16.msra.mxu1 %v3630_v12  ;;  %3052 = vmatpush3.bf16.msra.mxu0 %v3630_v12  ;;  %v3661_v24 = vpack.c.bf16 %v96_v20, %v93_v19  ;;  %v108_v32 = vand.u32 4294901760, %v3669_v28  ;;  %v3690_v36 = vsub.f32 %v59_v3, %v78_v6  ;;  %v111_v38 = vand.u32 4294901760, %v3684_v33  ;;  %v3714_v44 = vld [vmem:[#allocation5 + $0x78] sm:$0xff]  ;;  %s3518_s28 = scalar_lea.vmem %s2032_s27, 128 }
  0x3d   :  { %2981 = vmatprep.subr.bf16.mxu1 %v3551_v0  ;;  %3053 = vmatprep.subr.bf16.mxu0 %v3551_v0  ;;  %v3681_v31 = vpack.c.bf16 %v102_v26, %v99_v25  ;;  %v3696_v37 = vsub.f32 %v3655_v23, %v3672_v29  ;;  %v114_v39 = vand.u32 4294901760, %v3686_v34  ;;  %v3702_v41 = vsub.f32 %v60_v4, %v81_v8  ;;  %p3519_p10 = scmp.ne.s32.totalorder %s2032_s27, %s3518_s28  ;;  %p3524_p12 = scmp.lt.s32.totalorder %s3518_s28, %s3518_s28 }
  0x3e   :  { %v3704_v42 = vsub.f32 %v61_v7, %v84_v9  ;;  %v3712_v43 = vpack.c.bf16 %v108_v32, %v105_v30  ;;  %v168_v45 = vand.u32 4294901760, %v3688_v35  ;;  %v175_v46 = vand.u32 4294901760, %v3690_v36 }
  0x3f   :  { %v117_v47 = vand.u32 4294901760, %v3700_v40  ;;  %v157_v48 = vand.u32 4294901760, %v3696_v37  ;;  %v3722_v49 = vsub.f32 %v62_v10, %v87_v14  ;;  %v3728_v50 = vpack.c.bf16 %v114_v39, %v111_v38  ;;  %p3525_p13 = por %p3524_p12, %p3523_p11 }
  0x40   :  { %2983 = vmatpush3.bf16.msra.mxu1 %v3634_v13  ;;  %3055 = vmatpush3.bf16.msra.mxu0 %v3634_v13  ;;  %v120_v51 = vand.u32 4294901760, %v3714_v44  ;;  %v182_v52 = vand.u32 4294901760, %v3702_v41  ;;  %v189_v53 = vand.u32 4294901760, %v3704_v42  ;;  %v169_v54 = vsub.f32 %v3688_v35, %v168_v45 }
  0x41   :  { %2984 = vmatprep.subr.bf16.mxu1 %v3551_v0  ;;  %3056 = vmatprep.subr.bf16.mxu0 %v3551_v0  ;;  %v176_v55 = vsub.f32 %v3690_v36, %v175_v46  ;;  %v3738_v56 = vsub.f32 %v3628_v11, %v90_v15  ;;  %v158_v57 = vsub.f32 %v3696_v37, %v157_v48  ;;  %v196_v58 = vand.u32 4294901760, %v3722_v49  ;;  %p3526_p0 = pnand %p3525_p13, %p3519_p10 }
  0x42   :  { %v3748_v59 = vpack.c.bf16 %v120_v51, %v117_v47  ;;  %v183_v60 = vsub.f32 %v3702_v41, %v182_v52  ;;  %v190_v61 = vsub.f32 %v3704_v42, %v189_v53  ;;  %v3753_v62 = vsub.f32 %v3639_v16, %v93_v19 }
  0x43   :  { %v170_v63 = vand.u32 4294901760, %v169_v54  ;;  %v177_v2 = vand.u32 4294901760, %v176_v55  ;;  %v203_v3 = vand.u32 4294901760, %v3738_v56  ;;  %v3761_v4 = vsub.f32 %v3641_v17, %v96_v20 }
  0x44   :  { %2986 = vmatpush3.bf16.msra.mxu1 %v3645_v18  ;;  %3058 = vmatpush3.bf16.msra.mxu0 %v3645_v18  ;;  %v159_v5 = vand.u32 4294901760, %v158_v57  ;;  %v3765_v6 = vpack.c.bf16 %v175_v46, %v168_v45  ;;  %v197_v7 = vsub.f32 %v3722_v49, %v196_v58  ;;  %v184_v8 = vand.u32 4294901760, %v183_v60 }
  0x45   :  { %2987 = vmatprep.subr.bf16.mxu1 %v3551_v0  ;;  %3059 = vmatprep.subr.bf16.mxu0 %v3551_v0  ;;  %v191_v9 = vand.u32 4294901760, %v190_v61  ;;  %v3771_v10 = vsub.f32 %v3651_v21, %v99_v25  ;;  %v3776_v11 = vsub.f32 %v3653_v22, %v102_v26  ;;  %v3780_v14 = vpack.c.bf16 %v177_v2, %v170_v63 }
  0x46   :  { %v204_v15 = vsub.f32 %v3738_v56, %v203_v3  ;;  %v210_v16 = vand.u32 4294901760, %v3753_v62  ;;  %v217_v17 = vand.u32 4294901760, %v3761_v4  ;;  %v3787_v19 = vpack.c.bf16 %v189_v53, %v182_v52 }
  0x47   :  { %v198_v20 = vand.u32 4294901760, %v197_v7  ;;  %v224_v21 = vand.u32 4294901760, %v3771_v10  ;;  %v231_v22 = vand.u32 4294901760, %v3776_v11  ;;  %v3794_v25 = vsub.f32 %v3665_v27, %v105_v30 }
  0x48   :  { %2989 = vmatpush3.bf16.msra.mxu1 %v3661_v24  ;;  %3061 = vmatpush3.bf16.msra.mxu0 %v3661_v24  ;;  %v3799_v26 = vsub.f32 %v3669_v28, %v108_v32  ;;  %v3803_v45 = vpack.c.bf16 %v191_v9, %v184_v8  ;;  %v205_v46 = vand.u32 4294901760, %v204_v15  ;;  %v218_v52 = vsub.f32 %v3761_v4, %v217_v17 }
  0x49   :  { %2990 = vmatprep.subr.bf16.mxu1 %v3551_v0  ;;  %3062 = vmatprep.subr.bf16.mxu0 %v3551_v0  ;;  %v3809_v27 = vpack.c.bf16 %v203_v3, %v196_v58  ;;  %v3814_v28 = vsub.f32 %v3684_v33, %v111_v38  ;;  %v225_v30 = vsub.f32 %v3771_v10, %v224_v21  ;;  %v238_v53 = vand.u32 4294901760, %v3794_v25 }
  0x4a   :  { %v232_v32 = vsub.f32 %v3776_v11, %v231_v22  ;;  %v245_v54 = vand.u32 4294901760, %v3799_v26  ;;  %v3826_v33 = vpack.c.bf16 %v205_v46, %v198_v20  ;;  %v219_v55 = vand.u32 4294901760, %v218_v52 }
  0x4b   :  { %v3831_v57 = vsub.f32 %v3686_v34, %v114_v39  ;;  %v3835_v58 = vpack.c.bf16 %v217_v17, %v210_v16  ;;  %v252_v60 = vand.u32 4294901760, %v3814_v28  ;;  %v226_v61 = vand.u32 4294901760, %v225_v30 }
  0x4c   :  { %2992 = vmatpush3.bf16.msra.mxu1 %v3681_v31  ;;  %3064 = vmatpush3.bf16.msra.mxu0 %v3681_v31  ;;  %v233_v63 = vand.u32 4294901760, %v232_v32  ;;  %v239_v2 = vsub.f32 %v3794_v25, %v238_v53  ;;  %v246_v3 = vsub.f32 %v3799_v26, %v245_v54  ;;  %v3853_v7 = vsub.f32 %v3714_v44, %v120_v51 }
  0x4d   :  { %2993 = vmatprep.subr.bf16.mxu1 %v3551_v0  ;;  %3065 = vmatprep.subr.bf16.mxu0 %v3551_v0  ;;  %v259_v39 = vand.u32 4294901760, %v3831_v57  ;;  %v3857_v8 = vpack.c.bf16 %v231_v22, %v224_v21  ;;  %v3869_v17 = vpack.c.bf16 %v245_v54, %v238_v53 }
  0x4e   :  { %v240_v9 = vand.u32 4294901760, %v239_v2  ;;  %v247_v15 = vand.u32 4294901760, %v246_v3  ;;  %v273_v51 = vand.u32 4294901760, %v3853_v7  ;;  %v1363_v3 = vld [vmem:[#allocation7 + $0x18] sm:$0xff] }
  0x4f   :  { %v3883_v30 = vpack.c.bf16 %v259_v39, %v252_v60 }
  0x50   :  { %2995 = vmatpush3.bf16.msra.mxu1 %v3712_v43  ;;  %3067 = vmatpush3.bf16.msra.mxu0 %v3712_v43  ;;  %v3873_v21 = vpack.c.bf16 %v247_v15, %v240_v9 }
  0x51   :  { %2996 = vmatprep.subr.bf16.mxu1 %v3551_v0  ;;  %3068 = vmatprep.subr.bf16.mxu0 %v3551_v0 }
  0x54   :  { %2998 = vmatpush3.bf16.msra.mxu1 %v3728_v50  ;;  %3070 = vmatpush3.bf16.msra.mxu0 %v3728_v50 }
  0x55   :  { %2999 = vmatprep.subr.bf16.mxu1 %v3551_v0  ;;  %3071 = vmatprep.subr.bf16.mxu0 %v3551_v0 }
  0x58   :  { %3001 = vmatpush3.bf16.msra.mxu1 %v3748_v59  ;;  %3073 = vmatpush3.bf16.msra.mxu0 %v3748_v59 }
  0x59   :  { %3002 = vmatprep.subr.bf16.mxu1 %v3551_v0  ;;  %3074 = vmatprep.subr.bf16.mxu0 %v3551_v0 }
  0x5b   :  { %2381 = vmatmul.mubr.f32.vlgmr.msra.gmra.mrb[0].mxu1 %v159_v5  ;;  %2486 = vmatmul.mubr.f32.vlgmr.msra.gmra.mrb[0].mxu0 %v157_v48  ;;  %v211_v48 = vsub.f32 %v3753_v62, %v210_v16  ;;  %v3848_v5 = vsub.f32 %v3700_v40, %v117_v47  ;;  %v253_v16 = vsub.f32 %v3814_v28, %v252_v60 }
  0x5c   :  { %3004 = vmatpush3.bf16.msra.mxu1 %v3780_v14  ;;  %3076 = vmatpush3.bf16.msra.mxu0 %v3765_v6  ;;  %v3862_v40 = vpack.c.bf16 %v233_v63, %v226_v61  ;;  %v260_v47 = vsub.f32 %v3831_v57, %v259_v39  ;;  %v3909_v60 = vpack.c.bf16 %v3704_v42, %v3702_v41  ;;  %v1393_v39 = vand.u32 4294901760, %v1363_v3 }
  0x5d   :  { %3005 = vmatprep.subr.bf16.mxu1 %v3551_v0  ;;  %3077 = vmatprep.subr.bf16.mxu0 %v3551_v0  ;;  %v212_v38 = vand.u32 4294901760, %v211_v48  ;;  %v266_v44 = vand.u32 4294901760, %v3848_v5  ;;  %v254_v20 = vand.u32 4294901760, %v253_v16  ;;  %v274_v48 = vsub.f32 %v3853_v7, %v273_v51 }
  0x5e   :  { %2415 = vmatprep.mubr.msk.f32.mxu1 %vm3552_vm0, %v3553_v1  ;;  %2520 = vmatprep.mubr.msk.f32.mxu0 %vm3552_vm0, %v3553_v1  ;;  %v261_v22 = vand.u32 4294901760, %v260_v47  ;;  %v3937_v41 = vpack.c.bf16 %v3776_v11, %v3771_v10  ;;  %v3945_v42 = vpack.c.bf16 %v3799_v26, %v3794_v25  ;;  %v4036_v16 = vsub.f32 %v1363_v3, %v1393_v39 }
  0x5f   :  { %v3842_v34 = vpack.c.bf16 %v219_v55, %v212_v38  ;;  %v267_v46 = vsub.f32 %v3848_v5, %v266_v44  ;;  %v275_v53 = vand.u32 4294901760, %v274_v48  ;;  %v3891_v38 = vpack.c.bf16 %v273_v51, %v266_v44  ;;  %v1370_v51 = vld [vmem:[#allocation7 + $0x50] sm:$0xff]  ;;  %v1373_v48 = vld [vmem:[#allocation7 + $0x68] sm:$0xff] }
  0x60   :  { %3007 = vmatpush3.bf16.msra.mxu1 %v3803_v45  ;;  %3079 = vmatpush3.bf16.msra.mxu0 %v3787_v19  ;;  %v3881_v52 = vpack.c.bf16 %v261_v22, %v254_v20  ;;  %v3899_v55 = vpack.c.bf16 %v3690_v36, %v3688_v35  ;;  %v3921_v35 = vpack.c.bf16 %v3738_v56, %v3722_v49  ;;  %v1414_v20 = vand.u32 4294901760, %v1370_v51 }
  0x61   :  { %3008 = vmatprep.subr.bf16.mxu1 %v3551_v0  ;;  %3080 = vmatprep.subr.bf16.mxu0 %v3551_v0  ;;  %v268_v32 = vand.u32 4294901760, %v267_v46  ;;  %v3929_v36 = vpack.c.bf16 %v3761_v4, %v3753_v62  ;;  %v3953_v49 = vpack.c.bf16 %v3831_v57, %v3814_v28  ;;  %v3961_v56 = vpack.c.bf16 %v3853_v7, %v3848_v5  ;;  %v1372_v46 = vld [vmem:[#allocation7 + $0x60] sm:$0xff] }
  0x63   :  { %v3889_v54 = vpack.c.bf16 %v275_v53, %v268_v32 }
  0x64   :  { %3010 = vmatpush3.bf16.msra.mxu1 %v3826_v33  ;;  %3082 = vmatpush3.bf16.msra.mxu0 %v3809_v27 }
  0x65   :  { %3011 = vmatprep.subr.bf16.mxu1 %v3551_v0  ;;  %3083 = vmatprep.subr.bf16.mxu0 %v3551_v0 }
  0x68   :  { %3013 = vmatpush3.bf16.msra.mxu1 %v3842_v34  ;;  %3085 = vmatpush3.bf16.msra.mxu0 %v3835_v58 }
  0x69   :  { %3014 = vmatprep.subr.bf16.mxu1 %v3551_v0  ;;  %3086 = vmatprep.subr.bf16.mxu0 %v3551_v0 }
  0x6c   :  { %3016 = vmatpush3.bf16.msra.mxu1 %v3862_v40  ;;  %3088 = vmatpush3.bf16.msra.mxu0 %v3857_v8 }
  0x6d   :  { %3017 = vmatprep.subr.bf16.mxu1 %v3551_v0  ;;  %3089 = vmatprep.subr.bf16.mxu0 %v3551_v0 }
  0x70   :  { %3019 = vmatpush3.bf16.msra.mxu1 %v3873_v21  ;;  %3091 = vmatpush3.bf16.msra.mxu0 %v3869_v17 }
  0x71   :  { %3020 = vmatprep.subr.bf16.mxu1 %v3551_v0  ;;  %3092 = vmatprep.subr.bf16.mxu0 %v3551_v0 }
  0x74   :  { %3022 = vmatpush3.bf16.msra.mxu1 %v3881_v52  ;;  %3094 = vmatpush3.bf16.msra.mxu0 %v3883_v30 }
  0x75   :  { %3023 = vmatprep.subr.bf16.mxu1 %v3551_v0  ;;  %3095 = vmatprep.subr.bf16.mxu0 %v3551_v0 }
  0x78   :  { %3025 = vmatpush3.bf16.msra.mxu1 %v3889_v54  ;;  %3097 = vmatpush3.bf16.msra.mxu0 %v3891_v38 }
  0x79   :  { %3026 = vmatprep.subr.bf16.mxu1 %v3551_v0  ;;  %3098 = vmatprep.subr.bf16.mxu0 %v3551_v0 }
  0x7b   :  { %2416 = vmatmul.mubr.f32.vlgmr.msra.gmra.mrb[0].mxu1 %v3672_v29  ;;  %2521 = vmatmul.mubr.f32.vlgmr.msra.gmra.mrb[0].mxu0 %v3672_v29 }
  0x7c   :  { %3028 = vmatpush3.bf16.msra.mxu1 %v3899_v55  ;;  %3100 = vmatpush3.bf16.msra.mxu0 %v3630_v12 }
  0x7d   :  { %3029 = vmatprep.subr.bf16.mxu1 %v3551_v0  ;;  %3101 = vmatprep.subr.bf16.mxu0 %v3551_v0 }
  0x7e   :  { %2450 = vmatprep.mubr.msk.f32.mxu1 %vm3552_vm0, %v3553_v1  ;;  %2555 = vmatprep.mubr.msk.f32.mxu0 %vm3552_vm0, %v3553_v1 }
  0x80   :  { %3031 = vmatpush3.bf16.msra.mxu1 %v3909_v60  ;;  %3103 = vmatpush3.bf16.msra.mxu0 %v3634_v13 }
  0x81   :  { %3032 = vmatprep.subr.bf16.mxu1 %v3551_v0  ;;  %3104 = vmatprep.subr.bf16.mxu0 %v3551_v0 }
  0x84   :  { %3034 = vmatpush3.bf16.msra.mxu1 %v3921_v35  ;;  %3106 = vmatpush3.bf16.msra.mxu0 %v3645_v18 }
  0x85   :  { %3035 = vmatprep.subr.bf16.mxu1 %v3551_v0  ;;  %3107 = vmatprep.subr.bf16.mxu0 %v3551_v0 }
  0x88   :  { %3037 = vmatpush3.bf16.msra.mxu1 %v3929_v36  ;;  %3109 = vmatpush3.bf16.msra.mxu0 %v3661_v24 }
  0x89   :  { %3038 = vmatprep.subr.bf16.mxu1 %v3551_v0  ;;  %3110 = vmatprep.subr.bf16.mxu0 %v3551_v0 }
  0x8c   :  { %3040 = vmatpush3.bf16.msra.mxu1 %v3937_v41  ;;  %3112 = vmatpush3.bf16.msra.mxu0 %v3681_v31 }
  0x8d   :  { %3041 = vmatprep.subr.bf16.mxu1 %v3551_v0  ;;  %3113 = vmatprep.subr.bf16.mxu0 %v3551_v0 }
  0x90   :  { %3043 = vmatpush3.bf16.msra.mxu1 %v3945_v42  ;;  %3115 = vmatpush3.bf16.msra.mxu0 %v3712_v43 }
  0x91   :  { %3044 = vmatprep.subr.bf16.mxu1 %v3551_v0  ;;  %3116 = vmatprep.subr.bf16.mxu0 %v3551_v0 }
  0x94   :  { %3046 = vmatpush3.bf16.msra.mxu1 %v3953_v49  ;;  %3118 = vmatpush3.bf16.msra.mxu0 %v3728_v50 }
  0x95   :  { %3047 = vmatprep.subr.bf16.mxu1 %v3551_v0  ;;  %3119 = vmatprep.subr.bf16.mxu0 %v3551_v0 }
  0x98   :  { %3049 = vmatpush3.bf16.msra.mxu1 %v3961_v56  ;;  %3121 = vmatpush3.bf16.msra.mxu0 %v3748_v59 }
  0x99   :  { %3122 = vmatprep.subr.bf16.mxu1 %v3551_v0  ;;  %3266 = vmatprep.subr.bf16.mxu0 %v3551_v0 }
  0x9b   :  { %2451 = vmatmul.mubr.f32.vlgmr.msra.gmra.mrb[0].mxu1 %v3696_v37  ;;  %2556 = vmatmul.mubr.f32.vlgmr.msra.gmra.mrb[0].mxu0 %v3672_v29 }
  0x9c   :  { %3124 = vmatpush3.bf16.msra.mxu1 %v3630_v12  ;;  %2590 = vmatprep.mubr.msk.f32.mxu1 %vm3552_vm0, %v3553_v1 }
  0x9d   :  { %3125 = vmatprep.subr.bf16.mxu1 %v3551_v0  ;;  %2800 = vmatprep.mubr.msk.f32.mxu0 %vm3552_vm0, %v3553_v1 }
  0xa0   :  { %3127 = vmatpush3.bf16.msra.mxu1 %v3634_v13 }
  0xa1   :  { %3128 = vmatprep.subr.bf16.mxu1 %v3551_v0 }
  0xa4   :  { %3130 = vmatpush3.bf16.msra.mxu1 %v3645_v18 }
  0xa5   :  { %3131 = vmatprep.subr.bf16.mxu1 %v3551_v0 }
  0xa8   :  { %3133 = vmatpush3.bf16.msra.mxu1 %v3661_v24 }
  0xa9   :  { %3134 = vmatprep.subr.bf16.mxu1 %v3551_v0 }
  0xac   :  { %3136 = vmatpush3.bf16.msra.mxu1 %v3681_v31 }
  0xad   :  { %3137 = vmatprep.subr.bf16.mxu1 %v3551_v0 }
  0xb0   :  { %3139 = vmatpush3.bf16.msra.mxu1 %v3712_v43 }
  0xb1   :  { %3140 = vmatprep.subr.bf16.mxu1 %v3551_v0 }
  0xb4   :  { %3142 = vmatpush3.bf16.msra.mxu1 %v3728_v50 }
  0xb5   :  { %3143 = vmatprep.subr.bf16.mxu1 %v3551_v0 }
  0xb8   :  { %3145 = vmatpush3.bf16.msra.mxu1 %v3748_v59 }
  0xb9   :  { %3146 = vmatprep.subr.bf16.mxu1 %v3551_v0 }
 0x16e   :  { %v416_v29 = vpop.f32.mrb[0].mxu1  ;;  %v711_v37 = vpop.f32.mrb[0].mxu0 }
 0x16f   :  { %v3410_v62 = vadd.f32 %v711_v37, %v416_v29  ;;  %v2452_v4 = vpop.f32.mrb[1].mxu1  ;;  %v2557_v10 = vpop.f32.mrb[1].mxu0 }
 0x171   :  { %v3992_v11 = vsub.f32 %v3655_v23, %v3410_v62  ;;  %v1360_v23 = vld [vmem:[#allocation7] sm:$0xff] }
 0x173   :  { %v716_v25 = vmul.f32 %v3992_v11, %v3992_v11 }
 0x175   :  { %v3996_v26 = vand.u32 4294901760, %v716_v25 }
 0x177   :  { %v3999_v28 = vsub.f32 %v716_v25, %v3996_v26 }
 0x179   :  { %v800_v57 = vand.u32 4294901760, %v3999_v28 }
 0x17b   :  { %v801_v61 = vsub.f32 %v3999_v28, %v800_v57 }
 0x17d   :  { %v802_v63 = vand.u32 4294901760, %v801_v61 }
 0x17f   :  { %2591 = vmatmul.mubr.f32.vlgmr.msra.gmra.mrb[2].mxu1 %v802_v63 }
 0x180   :  { %3148 = vmatpush3.bf16.msra.mxu1 %v3780_v14  ;;  %2625 = vmatprep.mubr.msk.f32.mxu1 %vm3552_vm0, %v3553_v1  ;;  %v1361_v14 = vld [vmem:[#allocation7 + $0x8] sm:$0xff] }
 0x181   :  { %3149 = vmatprep.subr.bf16.mxu1 %v3551_v0  ;;  %v1387_v2 = vand.u32 4294901760, %v1361_v14 }
 0x183   :  { %v4032_v9 = vsub.f32 %v1361_v14, %v1387_v2 }
 0x184   :  { %3151 = vmatpush3.bf16.msra.mxu1 %v3803_v45  ;;  %v1362_v45 = vld [vmem:[#allocation7 + $0x10] sm:$0xff] }
 0x185   :  { %3152 = vmatprep.subr.bf16.mxu1 %v3551_v0  ;;  %v1484_v10 = vand.u32 4294901760, %v4032_v9 }
 0x187   :  { %v1485_v61 = vsub.f32 %v4032_v9, %v1484_v10 }
 0x188   :  { %3154 = vmatpush3.bf16.msra.mxu1 %v3826_v33  ;;  %v1384_v33 = vand.u32 4294901760, %v1360_v23 }
 0x189   :  { %3155 = vmatprep.subr.bf16.mxu1 %v3551_v0 }
 0x18a   :  { %v4028_v5 = vpack.c.bf16 %v1387_v2, %v1384_v33  ;;  %v4030_v7 = vsub.f32 %v1360_v23, %v1384_v33  ;;  %v1486_v23 = vand.u32 4294901760, %v1485_v61 }
 0x18c   :  { %3157 = vmatpush3.bf16.msra.mxu1 %v3842_v34  ;;  %v1390_v34 = vand.u32 4294901760, %v1362_v45  ;;  %3268 = vmatpush3.bf16.msra.mxu0 %v4028_v5  ;;  %v1477_v4 = vand.u32 4294901760, %v4030_v7 }
 0x18d   :  { %3158 = vmatprep.subr.bf16.mxu1 %v3551_v0  ;;  %3269 = vmatprep.subr.bf16.mxu0 %v3551_v0 }
 0x18e   :  { %v4034_v15 = vsub.f32 %v1362_v45, %v1390_v34  ;;  %v1498_v45 = vand.u32 4294901760, %v4036_v16 }
 0x190   :  { %3160 = vmatpush3.bf16.msra.mxu1 %v3862_v40  ;;  %v4040_v40 = vpack.c.bf16 %v1393_v39, %v1390_v34  ;;  %v1491_v14 = vand.u32 4294901760, %v4034_v15  ;;  %v1499_v3 = vsub.f32 %v4036_v16, %v1498_v45 }
 0x191   :  { %3161 = vmatprep.subr.bf16.mxu1 %v3551_v0 }
 0x192   :  { %3271 = vmatpush3.bf16.msra.mxu0 %v4040_v40  ;;  %v1492_v2 = vsub.f32 %v4034_v15, %v1491_v14  ;;  %v1500_v39 = vand.u32 4294901760, %v1499_v3 }
 0x193   :  { %3272 = vmatprep.subr.bf16.mxu0 %v3551_v0 }
 0x194   :  { %3163 = vmatpush3.bf16.msra.mxu1 %v3873_v21  ;;  %v1493_v34 = vand.u32 4294901760, %v1492_v2 }
 0x195   :  { %3164 = vmatprep.subr.bf16.mxu1 %v3551_v0 }
 0x198   :  { %3166 = vmatpush3.bf16.msra.mxu1 %v3881_v52  ;;  %v1420_v52 = vand.u32 4294901760, %v1372_v46 }
 0x199   :  { %3167 = vmatprep.subr.bf16.mxu1 %v3551_v0 }
 0x19c   :  { %3169 = vmatpush3.bf16.msra.mxu1 %v3889_v54 }
 0x19d   :  { %3170 = vmatprep.subr.bf16.mxu1 %v3551_v0 }
 0x19f   :  { %2626 = vmatmul.mubr.f32.vlgmr.msra.gmra.mrb[2].mxu1 %v3996_v26 }
 0x1a0   :  { %3172 = vmatpush3.bf16.msra.mxu1 %v3899_v55  ;;  %2660 = vmatprep.mubr.msk.f32.mxu1 %vm3552_vm0, %v3553_v1  ;;  %v1374_v55 = vld [vmem:[#allocation7 + $0x70] sm:$0xff] }
 0x1a1   :  { %3173 = vmatprep.subr.bf16.mxu1 %v3551_v0  ;;  %v1426_v37 = vand.u32 4294901760, %v1374_v55 }
 0x1a3   :  { %v4157_v25 = vsub.f32 %v1374_v55, %v1426_v37 }
 0x1a4   :  { %3175 = vmatpush3.bf16.msra.mxu1 %v3909_v60  ;;  %v1375_v60 = vld [vmem:[#allocation7 + $0x78] sm:$0xff] }
 0x1a5   :  { %3176 = vmatprep.subr.bf16.mxu1 %v3551_v0  ;;  %v1429_v62 = vand.u32 4294901760, %v1375_v60 }
 0x1a8   :  { %3178 = vmatpush3.bf16.msra.mxu1 %v3921_v35 }
 0x1a9   :  { %3179 = vmatprep.subr.bf16.mxu1 %v3551_v0 }
 0x1ac   :  { %3181 = vmatpush3.bf16.msra.mxu1 %v3929_v36 }
 0x1ad   :  { %3182 = vmatprep.subr.bf16.mxu1 %v3551_v0 }
 0x1b0   :  { %3184 = vmatpush3.bf16.msra.mxu1 %v3937_v41  ;;  %v4144_v41 = vsub.f32 %v1370_v51, %v1414_v20 }
 0x1b1   :  { %3185 = vmatprep.subr.bf16.mxu1 %v3551_v0 }
 0x1b4   :  { %3187 = vmatpush3.bf16.msra.mxu1 %v3945_v42 }
 0x1b5   :  { %3188 = vmatprep.subr.bf16.mxu1 %v3551_v0 }
 0x1b8   :  { %3190 = vmatpush3.bf16.msra.mxu1 %v3953_v49 }
 0x1b9   :  { %3191 = vmatprep.subr.bf16.mxu1 %v3551_v0 }
 0x1bc   :  { %3193 = vmatpush3.bf16.msra.mxu1 %v3961_v56  ;;  %v4150_v56 = vsub.f32 %v1372_v46, %v1420_v52 }
 0x1bd   :  { %3194 = vmatprep.subr.bf16.mxu1 %v3551_v0 }
 0x1be   :  { %v4377_v2 = vand.u32 4294901760, %v4150_v56 }
 0x1bf   :  { %2661 = vmatmul.mubr.f32.vlgmr.msra.gmra.mrb[2].mxu1 %v3999_v28  ;;  %v4162_v28 = vsub.f32 %v1375_v60, %v1429_v62  ;;  %v1547_v60 = vand.u32 4294901760, %v4144_v41 }
 0x1c0   :  { %3196 = vmatpush3.bf16.msra.mxu1 %v3630_v12  ;;  %2695 = vmatprep.mubr.msk.f32.mxu1 %vm3552_vm0, %v3553_v1 }
 0x1c1   :  { %3197 = vmatprep.subr.bf16.mxu1 %v3551_v0 }
 0x1c4   :  { %3199 = vmatpush3.bf16.msra.mxu1 %v3634_v13 }
 0x1c5   :  { %3200 = vmatprep.subr.bf16.mxu1 %v3551_v0 }
 0x1c8   :  { %3202 = vmatpush3.bf16.msra.mxu1 %v3645_v18 }
 0x1c9   :  { %3203 = vmatprep.subr.bf16.mxu1 %v3551_v0 }
 0x1cc   :  { %3205 = vmatpush3.bf16.msra.mxu1 %v3661_v24 }
 0x1cd   :  { %3206 = vmatprep.subr.bf16.mxu1 %v3551_v0 }
 0x1d0   :  { %3208 = vmatpush3.bf16.msra.mxu1 %v3681_v31 }
 0x1d1   :  { %3209 = vmatprep.subr.bf16.mxu1 %v3551_v0 }
 0x1d4   :  { %3211 = vmatpush3.bf16.msra.mxu1 %v3712_v43 }
 0x1d5   :  { %3212 = vmatprep.subr.bf16.mxu1 %v3551_v0 }
 0x1d8   :  { %3214 = vmatpush3.bf16.msra.mxu1 %v3728_v50 }
 0x1d9   :  { %3215 = vmatprep.subr.bf16.mxu1 %v3551_v0 }
 0x1dc   :  { %3217 = vmatpush3.bf16.msra.mxu1 %v3748_v59 }
 0x1dd   :  { %3218 = vmatprep.subr.bf16.mxu1 %v3551_v0 }
 0x1df   :  { %2696 = vmatmul.mubr.f32.vlgmr.msra.gmra.mrb[2].mxu1 %v800_v57  ;;  %v1478_v57 = vsub.f32 %v4030_v7, %v1477_v4 }
 0x1e0   :  { %3220 = vmatpush3.bf16.msra.mxu1 %v3765_v6  ;;  %2730 = vmatprep.mubr.msk.f32.mxu1 %vm3552_vm0, %v3553_v1 }
 0x1e1   :  { %3221 = vmatprep.subr.bf16.mxu1 %v3551_v0  ;;  %v1479_v63 = vand.u32 4294901760, %v1478_v57  ;;  %v1548_v57 = vsub.f32 %v4144_v41, %v1547_v60 }
 0x1e3   :  { %v4174_v33 = vpack.c.bf16 %v1486_v23, %v1479_v63  ;;  %v1549_v63 = vand.u32 4294901760, %v1548_v57  ;;  %v3318_v57 = vpack.c.bf16 %v4036_v16, %v4034_v15 }
 0x1e4   :  { %3223 = vmatpush3.bf16.msra.mxu1 %v3787_v19  ;;  %v1367_v19 = vld [vmem:[#allocation7 + $0x38] sm:$0xff] }
 0x1e5   :  { %3224 = vmatprep.subr.bf16.mxu1 %v3551_v0 }
 0x1e8   :  { %3226 = vmatpush3.bf16.msra.mxu1 %v3809_v27  ;;  %v1405_v27 = vand.u32 4294901760, %v1367_v19 }
 0x1e9   :  { %3227 = vmatprep.subr.bf16.mxu1 %v3551_v0 }
 0x1ec   :  { %3229 = vmatpush3.bf16.msra.mxu1 %v3835_v58  ;;  %v1368_v58 = vld [vmem:[#allocation7 + $0x40] sm:$0xff] }
 0x1ed   :  { %3230 = vmatprep.subr.bf16.mxu1 %v3551_v0 }
 0x1f0   :  { %3232 = vmatpush3.bf16.msra.mxu1 %v3857_v8  ;;  %v1408_v8 = vand.u32 4294901760, %v1368_v58 }
 0x1f1   :  { %3233 = vmatprep.subr.bf16.mxu1 %v3551_v0 }
 0x1f2   :  { %v4140_v35 = vsub.f32 %v1368_v58, %v1408_v8 }
 0x1f4   :  { %3235 = vmatpush3.bf16.msra.mxu1 %v3869_v17  ;;  %v1371_v17 = vld [vmem:[#allocation7 + $0x58] sm:$0xff] }
 0x1f5   :  { %3236 = vmatprep.subr.bf16.mxu1 %v3551_v0  ;;  %v1417_v21 = vand.u32 4294901760, %v1371_v17 }
 0x1f7   :  { %v4128_v22 = vpack.c.bf16 %v1417_v21, %v1414_v20  ;;  %v4146_v42 = vsub.f32 %v1371_v17, %v1417_v21  ;;  %v1533_v20 = vand.u32 4294901760, %v4140_v35 }
 0x1f8   :  { %3238 = vmatpush3.bf16.msra.mxu1 %v3883_v30  ;;  %v1423_v30 = vand.u32 4294901760, %v1373_v48 }
 0x1f9   :  { %3239 = vmatprep.subr.bf16.mxu1 %v3551_v0  ;;  %v4379_v16 = vand.u32 4294901760, %v4146_v42 }
 0x1fa   :  { %v4148_v49 = vpack.c.bf16 %v1423_v30, %v1420_v52  ;;  %v4152_v29 = vsub.f32 %v1373_v48, %v1423_v30  ;;  %v1534_v48 = vsub.f32 %v4140_v35, %v1533_v20 }
 0x1fc   :  { %3241 = vmatpush3.bf16.msra.mxu1 %v3891_v38  ;;  %v4138_v38 = vsub.f32 %v1367_v19, %v1405_v27  ;;  %v1535_v30 = vand.u32 4294901760, %v1534_v48  ;;  %v4376_v3 = vand.u32 4294901760, %v4152_v29 }
 0x1fd   :  { %3242 = vmatprep.subr.bf16.mxu1 %v3551_v0 }
 0x1fe   :  { %v1526_v58 = vand.u32 4294901760, %v4138_v38 }
 0x1ff   :  { %2731 = vmatmul.mubr.f32.vlgmr.msra.gmra.mrb[2].mxu1 %v3996_v26 }
 0x200   :  { %3244 = vmatpush3.bf16.msra.mxu1 %v3630_v12  ;;  %2765 = vmatprep.mubr.msk.f32.mxu1 %vm3552_vm0, %v3553_v1  ;;  %v1364_v12 = vld [vmem:[#allocation7 + $0x20] sm:$0xff] }
 0x201   :  { %3245 = vmatprep.subr.bf16.mxu1 %v3551_v0 }
 0x204   :  { %3247 = vmatpush3.bf16.msra.mxu1 %v3634_v13  ;;  %v1365_v13 = vld [vmem:[#allocation7 + $0x28] sm:$0xff] }
 0x205   :  { %3248 = vmatprep.subr.bf16.mxu1 %v3551_v0 }
 0x208   :  { %3250 = vmatpush3.bf16.msra.mxu1 %v3645_v18  ;;  %v1396_v18 = vand.u32 4294901760, %v1364_v12 }
 0x209   :  { %3251 = vmatprep.subr.bf16.mxu1 %v3551_v0 }
 0x20a   :  { %v4132_v32 = vsub.f32 %v1364_v12, %v1396_v18 }
 0x20c   :  { %3253 = vmatpush3.bf16.msra.mxu1 %v3661_v24  ;;  %v1399_v24 = vand.u32 4294901760, %v1365_v13  ;;  %v1505_v12 = vand.u32 4294901760, %v4132_v32 }
 0x20d   :  { %3254 = vmatprep.subr.bf16.mxu1 %v3551_v0 }
 0x20e   :  { %v4116_v6 = vpack.c.bf16 %v1399_v24, %v1396_v18  ;;  %v4134_v53 = vsub.f32 %v1365_v13, %v1399_v24  ;;  %v4184_v18 = vpack.c.bf16 %v1500_v39, %v1493_v34  ;;  %v1506_v24 = vsub.f32 %v4132_v32, %v1505_v12 }
 0x20f   :  { %v1562_v39 = vsub.f32 %v4150_v56, %v4377_v2 }
 0x210   :  { %3256 = vmatpush3.bf16.msra.mxu1 %v3681_v31  ;;  %v1366_v31 = vld [vmem:[#allocation7 + $0x30] sm:$0xff]  ;;  %3274 = vmatpush3.bf16.msra.mxu0 %v4116_v6  ;;  %v1512_v13 = vand.u32 4294901760, %v4134_v53  ;;  %v1507_v19 = vand.u32 4294901760, %v1506_v24  ;;  %v1569_v24 = vsub.f32 %v4152_v29, %v4376_v3 }
 0x211   :  { %3257 = vmatprep.subr.bf16.mxu1 %v3551_v0  ;;  %3275 = vmatprep.subr.bf16.mxu0 %v3551_v0 }
 0x214   :  { %3259 = vmatpush3.bf16.msra.mxu1 %v3712_v43  ;;  %v1402_v43 = vand.u32 4294901760, %v1366_v31 }
 0x215   :  { %3260 = vmatprep.subr.bf16.mxu1 %v3551_v0 }
 0x216   :  { %v4136_v54 = vsub.f32 %v1366_v31, %v1402_v43  ;;  %v1513_v31 = vsub.f32 %v4134_v53, %v1512_v13 }
 0x218   :  { %3262 = vmatpush3.bf16.msra.mxu1 %v3728_v50  ;;  %v4120_v50 = vpack.c.bf16 %v1405_v27, %v1402_v43  ;;  %v1514_v43 = vand.u32 4294901760, %v1513_v31  ;;  %v1519_v27 = vand.u32 4294901760, %v4136_v54  ;;  %v1563_v31 = vand.u32 4294901760, %v1562_v39 }
 0x219   :  { %3263 = vmatprep.subr.bf16.mxu1 %v3551_v0  ;;  %v3330_v39 = vpack.c.bf16 %v4146_v42, %v4144_v41 }
 0x21a   :  { %3277 = vmatpush3.bf16.msra.mxu0 %v4120_v50 }
 0x21b   :  { %3278 = vmatprep.subr.bf16.mxu0 %v3551_v0 }
 0x21c   :  { %3265 = vmatpush3.bf16.msra.mxu1 %v3748_v59  ;;  %v1369_v59 = vld [vmem:[#allocation7 + $0x48] sm:$0xff] }
 0x21d   :  { %v1411_v47 = vand.u32 4294901760, %v1369_v59 }
 0x21f   :  { %2766 = vmatmul.mubr.f32.vlgmr.msra.gmra.mrb[2].mxu1 %v3996_v26  ;;  %v4124_v44 = vpack.c.bf16 %v1411_v47, %v1408_v8  ;;  %v4142_v36 = vsub.f32 %v1369_v59, %v1411_v47  ;;  %v4160_v26 = vpack.c.bf16 %v1429_v62, %v1426_v37  ;;  %v3297_v59 = vpack.c.bf16 %v1514_v43, %v1507_v19 }
 0x220   :  { %v1520_v8 = vsub.f32 %v4136_v54, %v1519_v27  ;;  %v1527_v47 = vsub.f32 %v4138_v38, %v1526_v58  ;;  %v4378_v37 = vand.u32 4294901760, %v4146_v42  ;;  %v1570_v19 = vand.u32 4294901760, %v1569_v24 }
 0x221   :  { %3280 = vmatpush3.bf16.msra.mxu0 %v4124_v44  ;;  %v1540_v21 = vand.u32 4294901760, %v4142_v36  ;;  %v4375_v43 = vand.u32 4294901760, %v4157_v25  ;;  %v3333_v24 = vpack.c.bf16 %v4152_v29, %v4150_v56 }
 0x222   :  { %3281 = vmatprep.subr.bf16.mxu0 %v3551_v0  ;;  %v1521_v51 = vand.u32 4294901760, %v1520_v8  ;;  %v1528_v17 = vand.u32 4294901760, %v1527_v47  ;;  %v1555_v61 = vsub.f32 %v4146_v42, %v4378_v37  ;;  %v4374_v8 = vand.u32 4294901760, %v4162_v28 }
 0x223   :  { %v1541_v52 = vsub.f32 %v4142_v36, %v1540_v21  ;;  %v3309_v47 = vpack.c.bf16 %v1570_v19, %v1563_v31  ;;  %v3336_v31 = vpack.c.bf16 %v4162_v28, %v4157_v25  ;;  %v3375_v15 = vpack.c.bf16 %v1540_v21, %v1533_v20 }
 0x224   :  { %v3300_v46 = vpack.c.bf16 %v1528_v17, %v1521_v51  ;;  %v1556_v23 = vand.u32 4294901760, %v1555_v61  ;;  %v1576_v51 = vsub.f32 %v4157_v25, %v4375_v43  ;;  %v1583_v17 = vsub.f32 %v4162_v28, %v4374_v8 }
 0x225   :  { %3283 = vmatpush3.bf16.msra.mxu0 %v4128_v22  ;;  %v1542_v55 = vand.u32 4294901760, %v1541_v52  ;;  %v3321_v61 = vpack.c.bf16 %v4134_v53, %v4132_v32  ;;  %v3378_v32 = vpack.c.bf16 %v4379_v16, %v1547_v60  ;;  %v4380_v53 = vand.u32 4294901760, %v4150_v56 }
 0x226   :  { %3284 = vmatprep.subr.bf16.mxu0 %v3551_v0  ;;  %v3306_v34 = vpack.c.bf16 %v1556_v23, %v1549_v63  ;;  %v1577_v48 = vand.u32 4294901760, %v1576_v51  ;;  %v1584_v52 = vand.u32 4294901760, %v1583_v17  ;;  %v3324_v63 = vpack.c.bf16 %v4138_v38, %v4136_v54 }
 0x227   :  { %v3303_v62 = vpack.c.bf16 %v1542_v55, %v1535_v30  ;;  %v3315_v55 = vpack.c.bf16 %v4032_v9, %v4030_v7  ;;  %v3327_v23 = vpack.c.bf16 %v4142_v36, %v4140_v35  ;;  %v3369_v7 = vpack.c.bf16 %v1512_v13, %v1505_v12 }
 0x228   :  { %v3312_v30 = vpack.c.bf16 %v1584_v52, %v1577_v48  ;;  %v3372_v9 = vpack.c.bf16 %v1526_v58, %v1519_v27  ;;  %v4381_v54 = vand.u32 4294901760, %v4152_v29  ;;  %v4382_v35 = vand.u32 4294901760, %v4157_v25 }
 0x229   :  { %3286 = vmatpush3.bf16.msra.mxu0 %v4148_v49  ;;  %v4383_v36 = vand.u32 4294901760, %v4162_v28 }
 0x22a   :  { %3287 = vmatprep.subr.bf16.mxu0 %v3551_v0  ;;  %v3381_v38 = vpack.c.bf16 %v4381_v54, %v4380_v53 }
 0x22d   :  { %3289 = vmatpush3.bf16.msra.mxu0 %v4160_v26 }
 0x22e   :  { %3290 = vmatprep.subr.bf16.mxu0 %v3551_v0 }
 0x2f2   :  { %v1354_v19 = vpop.f32.mrb[2].mxu1 }
 0x2f3   :  { %v3411_v51 = vadd.f32 1e-05, %v1354_v19  ;;  %v2767_v17 = vpop.f32.mrb[3].mxu1 }
 0x2f5   :  { %3450 = vrsqrt.f32 %v3411_v51 }
 0x2ff   :  { %v3451_v48 = vpop.eup %3450 }
 0x300   :  { %v1359_v52 = vmul.f32 %v3451_v48, %v3992_v11  ;;  %v3363_v11 = vpack.c.bf16 %v1484_v10, %v1477_v4  ;;  %v3384_v4 = vpack.c.bf16 %v4383_v36, %v4382_v35 }
 0x302   :  { %v4249_v8 = vand.u32 4294901760, %v1359_v52 }
 0x304   :  { %v1465_v43 = vsub.f32 %v1359_v52, %v4249_v8 }
 0x306   :  { %v1466_v3 = vand.u32 4294901760, %v1465_v43 }
 0x308   :  { %v1467_v2 = vsub.f32 %v1465_v43, %v1466_v3 }
 0x30a   :  { %v1468_v37 = vand.u32 4294901760, %v1467_v2 }
 0x30c   :  { %2801 = vmatmul.mubr.f32.vlgmr.msra.gmra.mrb[2].mxu0 %v1468_v37 }
 0x30d   :  { %3292 = vmatpush3.bf16.msra.mxu0 %v4174_v33  ;;  %2835 = vmatprep.mubr.msk.f32.mxu0 %vm3552_vm0, %v3553_v1  ;;  %v3366_v33 = vpack.c.bf16 %v1498_v45, %v1491_v14 }
 0x30e   :  { %3293 = vmatprep.subr.bf16.mxu0 %v3551_v0 }
 0x311   :  { %3295 = vmatpush3.bf16.msra.mxu0 %v4184_v18 }
 0x312   :  { %3296 = vmatprep.subr.bf16.mxu0 %v3551_v0 }
 0x315   :  { %3298 = vmatpush3.bf16.msra.mxu0 %v3297_v59 }
 0x316   :  { %3299 = vmatprep.subr.bf16.mxu0 %v3551_v0 }
 0x319   :  { %3301 = vmatpush3.bf16.msra.mxu0 %v3300_v46 }
 0x31a   :  { %3302 = vmatprep.subr.bf16.mxu0 %v3551_v0 }
 0x31d   :  { %3304 = vmatpush3.bf16.msra.mxu0 %v3303_v62 }
 0x31e   :  { %3305 = vmatprep.subr.bf16.mxu0 %v3551_v0 }
 0x321   :  { %3307 = vmatpush3.bf16.msra.mxu0 %v3306_v34 }
 0x322   :  { %3308 = vmatprep.subr.bf16.mxu0 %v3551_v0 }
 0x325   :  { %3310 = vmatpush3.bf16.msra.mxu0 %v3309_v47 }
 0x326   :  { %3311 = vmatprep.subr.bf16.mxu0 %v3551_v0 }
 0x329   :  { %3313 = vmatpush3.bf16.msra.mxu0 %v3312_v30 }
 0x32a   :  { %3314 = vmatprep.subr.bf16.mxu0 %v3551_v0 }
 0x32c   :  { %2836 = vmatmul.mubr.f32.vlgmr.msra.gmra.mrb[2].mxu0 %v4249_v8 }
 0x32d   :  { %3316 = vmatpush3.bf16.msra.mxu0 %v3315_v55  ;;  %2870 = vmatprep.mubr.msk.f32.mxu0 %vm3552_vm0, %v3553_v1 }
 0x32e   :  { %3317 = vmatprep.subr.bf16.mxu0 %v3551_v0 }
 0x331   :  { %3319 = vmatpush3.bf16.msra.mxu0 %v3318_v57 }
 0x332   :  { %3320 = vmatprep.subr.bf16.mxu0 %v3551_v0 }
 0x335   :  { %3322 = vmatpush3.bf16.msra.mxu0 %v3321_v61 }
 0x336   :  { %3323 = vmatprep.subr.bf16.mxu0 %v3551_v0 }
 0x339   :  { %3325 = vmatpush3.bf16.msra.mxu0 %v3324_v63 }
 0x33a   :  { %3326 = vmatprep.subr.bf16.mxu0 %v3551_v0 }
 0x33d   :  { %3328 = vmatpush3.bf16.msra.mxu0 %v3327_v23 }
 0x33e   :  { %3329 = vmatprep.subr.bf16.mxu0 %v3551_v0 }
 0x341   :  { %3331 = vmatpush3.bf16.msra.mxu0 %v3330_v39 }
 0x342   :  { %3332 = vmatprep.subr.bf16.mxu0 %v3551_v0 }
 0x345   :  { %3334 = vmatpush3.bf16.msra.mxu0 %v3333_v24 }
 0x346   :  { %3335 = vmatprep.subr.bf16.mxu0 %v3551_v0 }
 0x349   :  { %3337 = vmatpush3.bf16.msra.mxu0 %v3336_v31 }
 0x34a   :  { %3338 = vmatprep.subr.bf16.mxu0 %v3551_v0 }
 0x34c   :  { %2871 = vmatmul.mubr.f32.vlgmr.msra.gmra.mrb[2].mxu0 %v1465_v43 }
 0x34d   :  { %3340 = vmatpush3.bf16.msra.mxu0 %v4028_v5  ;;  %2905 = vmatprep.mubr.msk.f32.mxu0 %vm3552_vm0, %v3553_v1 }
 0x34e   :  { %3341 = vmatprep.subr.bf16.mxu0 %v3551_v0 }
 0x351   :  { %3343 = vmatpush3.bf16.msra.mxu0 %v4040_v40 }
 0x352   :  { %3344 = vmatprep.subr.bf16.mxu0 %v3551_v0 }
 0x355   :  { %3346 = vmatpush3.bf16.msra.mxu0 %v4116_v6 }
 0x356   :  { %3347 = vmatprep.subr.bf16.mxu0 %v3551_v0 }
 0x359   :  { %3349 = vmatpush3.bf16.msra.mxu0 %v4120_v50 }
 0x35a   :  { %3350 = vmatprep.subr.bf16.mxu0 %v3551_v0 }
 0x35d   :  { %3352 = vmatpush3.bf16.msra.mxu0 %v4124_v44 }
 0x35e   :  { %3353 = vmatprep.subr.bf16.mxu0 %v3551_v0 }
 0x361   :  { %3355 = vmatpush3.bf16.msra.mxu0 %v4128_v22 }
 0x362   :  { %3356 = vmatprep.subr.bf16.mxu0 %v3551_v0 }
 0x365   :  { %3358 = vmatpush3.bf16.msra.mxu0 %v4148_v49 }
 0x366   :  { %3359 = vmatprep.subr.bf16.mxu0 %v3551_v0 }
 0x369   :  { %3361 = vmatpush3.bf16.msra.mxu0 %v4160_v26 }
 0x36a   :  { %3362 = vmatprep.subr.bf16.mxu0 %v3551_v0 }
 0x36c   :  { %2906 = vmatmul.mubr.f32.vlgmr.msra.gmra.mrb[2].mxu0 %v1466_v3 }
 0x36d   :  { %3364 = vmatpush3.bf16.msra.mxu0 %v3363_v11  ;;  %2940 = vmatprep.mubr.msk.f32.mxu0 %vm3552_vm0, %v3553_v1 }
 0x36e   :  { %3365 = vmatprep.subr.bf16.mxu0 %v3551_v0 }
 0x371   :  { %3367 = vmatpush3.bf16.msra.mxu0 %v3366_v33 }
 0x372   :  { %3368 = vmatprep.subr.bf16.mxu0 %v3551_v0 }
 0x375   :  { %3370 = vmatpush3.bf16.msra.mxu0 %v3369_v7 }
 0x376   :  { %3371 = vmatprep.subr.bf16.mxu0 %v3551_v0 }
 0x379   :  { %3373 = vmatpush3.bf16.msra.mxu0 %v3372_v9 }
 0x37a   :  { %3374 = vmatprep.subr.bf16.mxu0 %v3551_v0 }
 0x37d   :  { %3376 = vmatpush3.bf16.msra.mxu0 %v3375_v15 }
 0x37e   :  { %3377 = vmatprep.subr.bf16.mxu0 %v3551_v0 }
 0x381   :  { %3379 = vmatpush3.bf16.msra.mxu0 %v3378_v32 }
 0x382   :  { %3380 = vmatprep.subr.bf16.mxu0 %v3551_v0 }
 0x385   :  { %3382 = vmatpush3.bf16.msra.mxu0 %v3381_v38 }
 0x386   :  { %3383 = vmatprep.subr.bf16.mxu0 %v3551_v0 }
 0x389   :  { %3385 = vmatpush3.bf16.msra.mxu0 %v3384_v4 }
 0x38a   :  { %3386 = vmatprep.subr.bf16.mxu0 %v3551_v0 }
 0x38c   :  { %2941 = vmatmul.mubr.f32.vlgmr.msra.gmra.mrb[2].mxu0 %v4249_v8 }
 0x38d   :  { %3388 = vmatpush3.bf16.msra.mxu0 %v4028_v5  ;;  %2975 = vmatprep.mubr.msk.f32.mxu0 %vm3552_vm0, %v3553_v1  ;;  %v2041_v1 = vld [vmem:[%s4372_s3] ss:$0 sm:$0xff] }
 0x38e   :  { %3389 = vmatprep.subr.bf16.mxu0 %v3551_v0 }
 0x391   :  { %3391 = vmatpush3.bf16.msra.mxu0 %v4040_v40 }
 0x392   :  { %3392 = vmatprep.subr.bf16.mxu0 %v3551_v0 }
 0x395   :  { %3394 = vmatpush3.bf16.msra.mxu0 %v4116_v6 }
 0x396   :  { %3395 = vmatprep.subr.bf16.mxu0 %v3551_v0 }
 0x399   :  { %3397 = vmatpush3.bf16.msra.mxu0 %v4120_v50 }
 0x39a   :  { %3398 = vmatprep.subr.bf16.mxu0 %v3551_v0 }
 0x39d   :  { %3400 = vmatpush3.bf16.msra.mxu0 %v4124_v44 }
 0x39e   :  { %3401 = vmatprep.subr.bf16.mxu0 %v3551_v0 }
 0x3a1   :  { %3403 = vmatpush3.bf16.msra.mxu0 %v4128_v22 }
 0x3a2   :  { %3404 = vmatprep.subr.bf16.mxu0 %v3551_v0 }
 0x3a5   :  { %3406 = vmatpush3.bf16.msra.mxu0 %v4148_v49 }
 0x3a6   :  { %3407 = vmatprep.subr.bf16.mxu0 %v3551_v0 }
 0x3a9   :  { %3409 = vmatpush3.bf16.msra.mxu0 %v4160_v26 }
 0x3ac   :  { %2976 = vmatmul.mubr.f32.vlgmr.msra.gmra.mrb[2].mxu0 %v4249_v8 }
 0x47f   :  { %v2020_v5 = vpop.f32.mrb[2].mxu0 }
 0x480   :  { %v3412_v40 = vadd.f32 %v2041_v1, %v2020_v5  ;;  %v2977_v6 = vpop.f32.mrb[3].mxu0 }
 0x482   :  { %2024 = vst [vmem:[#allocation8] sm:$0xff] %v3412_v40 }
 0x483   :  { %3529 = shalt.err (!%p3526_p0)
}
 0x484   :  { %s3530_s5 = scalar_lea.hbm %s4373_s4, 128 }
 0x485   :  { %p3531_p1 = scmp.ne.s32.totalorder %s4373_s4, %s3530_s5  ;;  %p3534_p2 = scmp.lt.u32.totalorder %s3530_s5, %s4373_s4 }
 0x487   :  { %p3536_p3 = pnand %p3534_p2, %p3531_p1 }
 0x489   :  { %3539 = shalt.err (!%p3536_p3)
}
 0x48a   :  { %2034 = dma.vmem_to_hbm [thread:$0]  %s2032_s27, 128, %s4373_s4, [#allocation4]  }
 0x48b   :  { %3544 = dma.done.wait [#allocation4], 128  }
 0x48c   :  { %3545 = vsyncadd [#allocation4], 4294967168 }
 0x48d   :  { %2038 = vsyncpa [#allocation3], 1 }
 0x48e   :  { %2039 = vsyncpa [#allocation6], 1 }
 0x48f   :  { %2040 = vsyncpa [#allocation4], 1 }

</bundles_post_ra>
